<compile_context>
chip_gen: v5e
topology: v5e:2x2
jax: 0.10.0
libtpu: 0.0.40
codegen_flags: <defaults>
</compile_context>

<pallas_src>
import jax
import jax.numpy as jnp
from jax.experimental import pallas as pl
from jax.experimental.pallas import tpu as pltpu


def ffn_kernel(x_ref, w1_ref, s1_ref, b1_ref, w2_ref, s2_ref, b2_ref, o_ref):
    # x_ref:  (Cin, TP)  f32        w1_ref: (Ch, Cin)  bf16   w2_ref: (Cout, Ch) bf16
    # s*/b*:  (Ch|Cout, 1) f32 folded BatchNorm scale / shift (conv bias included)
    x = x_ref[...]                              # f32, kept for the residual
    x_bf = x.astype(jnp.bfloat16)               # bf16 operand for the MXU

    # fc1: 1x1 conv == channel matmul (bf16 MXU, f32 accumulate), then BN affine
    h = jnp.dot(w1_ref[...], x_bf, preferred_element_type=jnp.float32)   # (Ch, TP)
    h = h * s1_ref[...] + b1_ref[...]

    # act: ReLU, then cast once to bf16 for the second MXU pass
    h = jnp.maximum(h, 0.0).astype(jnp.bfloat16)

    # fc2: 1x1 conv + BN affine
    y = jnp.dot(w2_ref[...], h, preferred_element_type=jnp.float32)      # (Cout, TP)
    y = y * s2_ref[...] + b2_ref[...]

    # drop_path is Identity -> residual add (f32)
    o_ref[...] = (y + x).astype(o_ref.dtype)


def fold_bn(conv_bias, gamma, beta, mean, var, eps=1e-5):
    scale = gamma / jnp.sqrt(var + eps)
    bias = beta + scale * (conv_bias - mean)
    return scale.astype(jnp.float32), bias.astype(jnp.float32)


def _round_up(v, m):
    return (v + m - 1) // m * m


def ffn_forward(x_nchw, params, *, tile_p=1024):
    """x_nchw: (N, Cin, H, W) float32.  Returns (N, Cin, H, W).

    tile_p: pixel-tile width (lane axis).  Sweep 512/1024/2048 per generation;
    it is clamped to the (128-padded) number of pixels for small inputs.
    """
    N, Cin, H, W = x_nchw.shape
    w1 = params["w1"].astype(jnp.bfloat16)       # (Ch, Cin)   conv-weight layout
    w2 = params["w2"].astype(jnp.bfloat16)       # (Cout, Ch)
    Ch = w1.shape[0]
    Cout = w2.shape[0]
    assert Cout == Cin, "residual requires out_features == in_features"

    s1, b1 = fold_bn(params["b1"], params["bn1_gamma"], params["bn1_beta"],
                     params["bn1_mean"], params["bn1_var"])
    s2, b2 = fold_bn(params["b2"], params["bn2_gamma"], params["bn2_beta"],
                     params["bn2_mean"], params["bn2_var"])
    s1 = s1.reshape(Ch, 1)
    b1 = b1.reshape(Ch, 1)
    s2 = s2.reshape(Cout, 1)
    b2 = b2.reshape(Cout, 1)

    # NCHW -> (N, Cin, P): pure reshape, no transpose.  Pixels go on the lane axis.
    P = H * W
    tile_p = min(tile_p, _round_up(P, 128))      # lane-dense tile (multiple of 128)
    P_pad = _round_up(P, tile_p)
    x3 = x_nchw.reshape(N, Cin, P)
    if P_pad != P:
        x3 = jnp.pad(x3, ((0, 0), (0, 0), (0, P_pad - P)))

    grid = (N, P_pad // tile_p)

    def call(weight_bufs):
        wkw = {} if weight_bufs is None else {"pipeline_mode": pl.Buffered(weight_bufs)}
        const2d = lambda n, p: (0, 0)
        in_specs = [
            pl.BlockSpec((None, Cin, tile_p), lambda n, p: (n, 0, p)),  # x tile (streamed)
            pl.BlockSpec((Ch, Cin), const2d, **wkw),                    # w1 (resident)
            pl.BlockSpec((Ch, 1), const2d, **wkw),                      # bn1 scale
            pl.BlockSpec((Ch, 1), const2d, **wkw),                      # bn1 shift
            pl.BlockSpec((Cout, Ch), const2d, **wkw),                   # w2 (resident)
            pl.BlockSpec((Cout, 1), const2d, **wkw),                    # bn2 scale
            pl.BlockSpec((Cout, 1), const2d, **wkw),                    # bn2 shift
        ]
        out_specs = pl.BlockSpec((None, Cout, tile_p), lambda n, p: (n, 0, p))
        return pl.pallas_call(
            ffn_kernel,
            out_shape=jax.ShapeDtypeStruct((N, Cout, P_pad), x_nchw.dtype),
            grid_spec=pltpu.PrefetchScalarGridSpec(
                num_scalar_prefetch=0,
                grid=grid,
                in_specs=in_specs,
                out_specs=out_specs,
            ),
            compiler_params=pltpu.CompilerParams(
                dimension_semantics=("parallel", "parallel"),
                vmem_limit_bytes=64 * 1024 * 1024,  # <= physical on v5e/v6e/v7x
            ),
        )(x3, w1, s1, b1, w2, s2, b2)

    try:
        out3 = call(1)          # single-buffer the grid-constant weights
    except Exception:           # Buffered(1)/pipeline_mode unsupported -> default buffering
        out3 = call(None)

    out3 = out3[:, :, :P]                      # drop pixel padding
    return out3.reshape(N, Cout, H, W)         # NCHW, no transpose needed


def make_params(key, in_features, hidden_features):
    ks = jax.random.split(key, 12)
    Cin, Ch, Cout = in_features, hidden_features, in_features
    p = {
        # Conv2d 1x1 weights in PyTorch (out, in) layout
        "w1": jax.random.normal(ks[0], (Ch, Cin), jnp.float32) * 0.1,
        "b1": jax.random.normal(ks[1], (Ch,), jnp.float32) * 0.1,
        "w2": jax.random.normal(ks[2], (Cout, Ch), jnp.float32) * 0.1,
        "b2": jax.random.normal(ks[3], (Cout,), jnp.float32) * 0.1,
        "bn1_gamma": 1.0 + 0.1 * jax.random.normal(ks[4], (Ch,), jnp.float32),
        "bn1_beta": 0.1 * jax.random.normal(ks[5], (Ch,), jnp.float32),
        "bn1_mean": 0.1 * jax.random.normal(ks[6], (Ch,), jnp.float32),
        "bn1_var": 0.5 + jnp.abs(jax.random.normal(ks[7], (Ch,), jnp.float32)),
        "bn2_gamma": 1.0 + 0.1 * jax.random.normal(ks[8], (Cout,), jnp.float32),
        "bn2_beta": 0.1 * jax.random.normal(ks[9], (Cout,), jnp.float32),
        "bn2_mean": 0.1 * jax.random.normal(ks[10], (Cout,), jnp.float32),
        "bn2_var": 0.5 + jnp.abs(jax.random.normal(ks[11], (Cout,), jnp.float32)),
    }
    return p


def ffn_reference(x_nchw, params, eps=1e-5):
    """Plain-JAX f32 reference of the same forward (inference-mode BN)."""
    def bn(y, g, b, m, v):
        inv = (g / jnp.sqrt(v + eps))[None, :, None, None]
        return (y - m[None, :, None, None]) * inv + b[None, :, None, None]

    h = jnp.einsum("oi,nihw->nohw", params["w1"], x_nchw) \
        + params["b1"][None, :, None, None]
    h = bn(h, params["bn1_gamma"], params["bn1_beta"],
           params["bn1_mean"], params["bn1_var"])
    h = jnp.maximum(h, 0.0)
    y = jnp.einsum("oi,nihw->nohw", params["w2"], h) \
        + params["b2"][None, :, None, None]
    y = bn(y, params["bn2_gamma"], params["bn2_beta"],
           params["bn2_mean"], params["bn2_var"])
    return y + x_nchw


if __name__ == "__main__":
    key = jax.random.PRNGKey(0)
    k_x, k_p = jax.random.split(key)

    N, Cin, H, W = 2, 4, 16, 16
    hidden = 32

    x = jax.random.normal(k_x, (N, Cin, H, W), jnp.float32)
    params = make_params(k_p, Cin, hidden)

    out = jax.block_until_ready(ffn_forward(x, params))
    ref = ffn_reference(x, params)

    assert out.shape == (N, Cin, H, W)
    # bf16 MXU operands (f32 accumulation) -> looser tolerance than pure-f32
    assert jnp.allclose(out, ref, atol=5e-2, rtol=5e-2), \
        float(jnp.max(jnp.abs(out - ref)))

    print("KERNEL_OK")
</pallas_src>

<mosaic_0001>
module attributes {stable_mosaic.version = 11 : i64} {
  func.func @ffn_kernel(%arg0: i32, %arg1: i32, %arg2: memref<1x4x256xf32, #tpu.memory_space<vmem>>, %arg3: memref<32x4xbf16, #tpu.memory_space<vmem>>, %arg4: memref<32x1xf32, #tpu.memory_space<vmem>>, %arg5: memref<32x1xf32, #tpu.memory_space<vmem>>, %arg6: memref<4x32xbf16, #tpu.memory_space<vmem>>, %arg7: memref<4x1xf32, #tpu.memory_space<vmem>>, %arg8: memref<4x1xf32, #tpu.memory_space<vmem>>, %arg9: memref<1x4x256xf32, #tpu.memory_space<vmem>>) attributes {dimension_semantics = [#tpu.dimension_semantics<parallel>, #tpu.dimension_semantics<parallel>], iteration_bounds = array<i64: 2, 1>, scalar_prefetch = 0 : i64, scratch_operands = 0 : i64, tpu.core_type = #tpu.core_type<tc>, window_params = [{transform_indices = @transform_0, window_bounds = array<i64: 1, 4, 256>}, {pipeline_mode = #tpu.pipeline_mode<synchronous>, transform_indices = @transform_1, window_bounds = array<i64: 32, 4>}, {pipeline_mode = #tpu.pipeline_mode<synchronous>, transform_indices = @transform_2, window_bounds = array<i64: 32, 1>}, {pipeline_mode = #tpu.pipeline_mode<synchronous>, transform_indices = @transform_3, window_bounds = array<i64: 32, 1>}, {pipeline_mode = #tpu.pipeline_mode<synchronous>, transform_indices = @transform_4, window_bounds = array<i64: 4, 32>}, {pipeline_mode = #tpu.pipeline_mode<synchronous>, transform_indices = @transform_5, window_bounds = array<i64: 4, 1>}, {pipeline_mode = #tpu.pipeline_mode<synchronous>, transform_indices = @transform_6, window_bounds = array<i64: 4, 1>}, {transform_indices = @transform_7, window_bounds = array<i64: 1, 4, 256>}]} {
    %c0 = arith.constant 0 : index
    %c0_0 = arith.constant 0 : index
    %c0_1 = arith.constant 0 : index
    %0 = vector.load %arg2[%c0, %c0_0, %c0_1] : memref<1x4x256xf32, #tpu.memory_space<vmem>>, vector<1x4x256xf32>
    %1 = vector.shape_cast %0 : vector<1x4x256xf32> to vector<4x256xf32>
    %2 = arith.truncf %1 : vector<4x256xf32> to vector<4x256xbf16>
    %c0_2 = arith.constant 0 : index
    %c0_3 = arith.constant 0 : index
    %3 = vector.load %arg3[%c0_2, %c0_3] : memref<32x4xbf16, #tpu.memory_space<vmem>>, vector<32x4xbf16>
    %cst = arith.constant dense<0.000000e+00> : vector<32x256xf32>
    %4 = tpu.matmul %3, %2, %cst {dimension_numbers = #tpu.dot_dimension_numbers<[1], [0], [0], [1], [0, 0, 1, 1], [], []>} : vector<32x4xbf16>, vector<4x256xbf16>, vector<32x256xf32> -> vector<32x256xf32>
    %c0_4 = arith.constant 0 : index
    %c0_5 = arith.constant 0 : index
    %5 = vector.load %arg4[%c0_4, %c0_5] : memref<32x1xf32, #tpu.memory_space<vmem>>, vector<32x1xf32>
    %6 = vector.broadcast %5 : vector<32x1xf32> to vector<32x256xf32>
    %7 = arith.mulf %4, %6 : vector<32x256xf32>
    %c0_6 = arith.constant 0 : index
    %c0_7 = arith.constant 0 : index
    %8 = vector.load %arg5[%c0_6, %c0_7] : memref<32x1xf32, #tpu.memory_space<vmem>>, vector<32x1xf32>
    %9 = vector.broadcast %8 : vector<32x1xf32> to vector<32x256xf32>
    %10 = arith.addf %7, %9 : vector<32x256xf32>
    %cst_8 = arith.constant 0.000000e+00 : f32
    %11 = vector.broadcast %cst_8 : f32 to vector<32x256xf32>
    %12 = arith.maximumf %10, %11 : vector<32x256xf32>
    %13 = arith.truncf %12 : vector<32x256xf32> to vector<32x256xbf16>
    %c0_9 = arith.constant 0 : index
    %c0_10 = arith.constant 0 : index
    %14 = vector.load %arg6[%c0_9, %c0_10] : memref<4x32xbf16, #tpu.memory_space<vmem>>, vector<4x32xbf16>
    %cst_11 = arith.constant dense<0.000000e+00> : vector<4x256xf32>
    %15 = tpu.matmul %14, %13, %cst_11 {dimension_numbers = #tpu.dot_dimension_numbers<[1], [0], [0], [1], [0, 0, 1, 1], [], []>} : vector<4x32xbf16>, vector<32x256xbf16>, vector<4x256xf32> -> vector<4x256xf32>
    %c0_12 = arith.constant 0 : index
    %c0_13 = arith.constant 0 : index
    %16 = vector.load %arg7[%c0_12, %c0_13] : memref<4x1xf32, #tpu.memory_space<vmem>>, vector<4x1xf32>
    %17 = vector.broadcast %16 : vector<4x1xf32> to vector<4x256xf32>
    %18 = arith.mulf %15, %17 : vector<4x256xf32>
    %c0_14 = arith.constant 0 : index
    %c0_15 = arith.constant 0 : index
    %19 = vector.load %arg8[%c0_14, %c0_15] : memref<4x1xf32, #tpu.memory_space<vmem>>, vector<4x1xf32>
    %20 = vector.broadcast %19 : vector<4x1xf32> to vector<4x256xf32>
    %21 = arith.addf %18, %20 : vector<4x256xf32>
    %22 = arith.addf %21, %1 : vector<4x256xf32>
    %c0_16 = arith.constant 0 : index
    %c0_17 = arith.constant 0 : index
    %c0_18 = arith.constant 0 : index
    %23 = vector.load %arg9[%c0_16, %c0_17, %c0_18] : memref<1x4x256xf32, #tpu.memory_space<vmem>>, vector<1x4x256xf32>
    %24 = vector.shape_cast %23 : vector<1x4x256xf32> to vector<4x256xf32>
    %25 = vector.shape_cast %22 : vector<4x256xf32> to vector<1x4x256xf32>
    tpu.vector_store %arg9[%c0_16, %c0_17, %c0_18], %25 {strides = array<i32>} : memref<1x4x256xf32, #tpu.memory_space<vmem>>, vector<1x4x256xf32>,
    return
  }
  func.func @transform_0(%arg0: i32, %arg1: i32) -> (i32, i32, i32) {
    %c0_i32 = arith.constant 0 : i32
    %c0_i32_0 = arith.constant 0 : i32
    return %arg0, %c0_i32, %arg1 : i32, i32, i32
  }
  func.func @transform_1(%arg0: i32, %arg1: i32) -> (i32, i32) {
    %c0_i32 = arith.constant 0 : i32
    %c0_i32_0 = arith.constant 0 : i32
    %c0_i32_1 = arith.constant 0 : i32
    return %c0_i32, %c0_i32_0 : i32, i32
  }
  func.func @transform_2(%arg0: i32, %arg1: i32) -> (i32, i32) {
    %c0_i32 = arith.constant 0 : i32
    %c0_i32_0 = arith.constant 0 : i32
    %c0_i32_1 = arith.constant 0 : i32
    return %c0_i32, %c0_i32_0 : i32, i32
  }
  func.func @transform_3(%arg0: i32, %arg1: i32) -> (i32, i32) {
    %c0_i32 = arith.constant 0 : i32
    %c0_i32_0 = arith.constant 0 : i32
    %c0_i32_1 = arith.constant 0 : i32
    return %c0_i32, %c0_i32_0 : i32, i32
  }
  func.func @transform_4(%arg0: i32, %arg1: i32) -> (i32, i32) {
    %c0_i32 = arith.constant 0 : i32
    %c0_i32_0 = arith.constant 0 : i32
    %c0_i32_1 = arith.constant 0 : i32
    return %c0_i32, %c0_i32_0 : i32, i32
  }
  func.func @transform_5(%arg0: i32, %arg1: i32) -> (i32, i32) {
    %c0_i32 = arith.constant 0 : i32
    %c0_i32_0 = arith.constant 0 : i32
    %c0_i32_1 = arith.constant 0 : i32
    return %c0_i32, %c0_i32_0 : i32, i32
  }
  func.func @transform_6(%arg0: i32, %arg1: i32) -> (i32, i32) {
    %c0_i32 = arith.constant 0 : i32
    %c0_i32_0 = arith.constant 0 : i32
    %c0_i32_1 = arith.constant 0 : i32
    return %c0_i32, %c0_i32_0 : i32, i32
  }
  func.func @transform_7(%arg0: i32, %arg1: i32) -> (i32, i32, i32) {
    %c0_i32 = arith.constant 0 : i32
    %c0_i32_0 = arith.constant 0 : i32
    return %arg0, %c0_i32, %arg1 : i32, i32, i32
  }
}

module attributes {stable_mosaic.version = 11 : i64} {
  func.func @ffn_kernel(%arg0: i32, %arg1: i32, %arg2: memref<1x4x256xf32, #tpu.memory_space<vmem>>, %arg3: memref<32x4xbf16, #tpu.memory_space<vmem>>, %arg4: memref<32x1xf32, #tpu.memory_space<vmem>>, %arg5: memref<32x1xf32, #tpu.memory_space<vmem>>, %arg6: memref<4x32xbf16, #tpu.memory_space<vmem>>, %arg7: memref<4x1xf32, #tpu.memory_space<vmem>>, %arg8: memref<4x1xf32, #tpu.memory_space<vmem>>, %arg9: memref<1x4x256xf32, #tpu.memory_space<vmem>>) attributes {dimension_semantics = [#tpu.dimension_semantics<parallel>, #tpu.dimension_semantics<parallel>], iteration_bounds = array<i64: 2, 1>, scalar_prefetch = 0 : i64, scratch_operands = 0 : i64, tpu.core_type = #tpu.core_type<tc>, window_params = [{transform_indices = @transform_0, window_bounds = array<i64: 1, 4, 256>}, {pipeline_mode = #tpu.pipeline_mode<synchronous>, transform_indices = @transform_1, window_bounds = array<i64: 32, 4>}, {pipeline_mode = #tpu.pipeline_mode<synchronous>, transform_indices = @transform_2, window_bounds = array<i64: 32, 1>}, {pipeline_mode = #tpu.pipeline_mode<synchronous>, transform_indices = @transform_3, window_bounds = array<i64: 32, 1>}, {pipeline_mode = #tpu.pipeline_mode<synchronous>, transform_indices = @transform_4, window_bounds = array<i64: 4, 32>}, {pipeline_mode = #tpu.pipeline_mode<synchronous>, transform_indices = @transform_5, window_bounds = array<i64: 4, 1>}, {pipeline_mode = #tpu.pipeline_mode<synchronous>, transform_indices = @transform_6, window_bounds = array<i64: 4, 1>}, {transform_indices = @transform_7, window_bounds = array<i64: 1, 4, 256>}]} {
    %c0 = arith.constant 0 : index
    %c0_0 = arith.constant 0 : index
    %c0_1 = arith.constant 0 : index
    %0 = vector.load %arg2[%c0, %c0_0, %c0_1] : memref<1x4x256xf32, #tpu.memory_space<vmem>>, vector<1x4x256xf32>
    %1 = vector.shape_cast %0 : vector<1x4x256xf32> to vector<4x256xf32>
    %2 = arith.truncf %1 : vector<4x256xf32> to vector<4x256xbf16>
    %c0_2 = arith.constant 0 : index
    %c0_3 = arith.constant 0 : index
    %3 = vector.load %arg3[%c0_2, %c0_3] : memref<32x4xbf16, #tpu.memory_space<vmem>>, vector<32x4xbf16>
    %cst = arith.constant dense<0.000000e+00> : vector<32x256xf32>
    %4 = tpu.matmul %3, %2, %cst {dimension_numbers = #tpu.dot_dimension_numbers<[1], [0], [0], [1], [0, 0, 1, 1], [], []>} : vector<32x4xbf16>, vector<4x256xbf16>, vector<32x256xf32> -> vector<32x256xf32>
    %c0_4 = arith.constant 0 : index
    %c0_5 = arith.constant 0 : index
    %5 = vector.load %arg4[%c0_4, %c0_5] : memref<32x1xf32, #tpu.memory_space<vmem>>, vector<32x1xf32>
    %6 = vector.broadcast %5 : vector<32x1xf32> to vector<32x256xf32>
    %7 = arith.mulf %4, %6 : vector<32x256xf32>
    %c0_6 = arith.constant 0 : index
    %c0_7 = arith.constant 0 : index
    %8 = vector.load %arg5[%c0_6, %c0_7] : memref<32x1xf32, #tpu.memory_space<vmem>>, vector<32x1xf32>
    %9 = vector.broadcast %8 : vector<32x1xf32> to vector<32x256xf32>
    %10 = arith.addf %7, %9 : vector<32x256xf32>
    %cst_8 = arith.constant 0.000000e+00 : f32
    %11 = vector.broadcast %cst_8 : f32 to vector<32x256xf32>
    %12 = arith.maximumf %10, %11 : vector<32x256xf32>
    %13 = arith.truncf %12 : vector<32x256xf32> to vector<32x256xbf16>
    %c0_9 = arith.constant 0 : index
    %c0_10 = arith.constant 0 : index
    %14 = vector.load %arg6[%c0_9, %c0_10] : memref<4x32xbf16, #tpu.memory_space<vmem>>, vector<4x32xbf16>
    %cst_11 = arith.constant dense<0.000000e+00> : vector<4x256xf32>
    %15 = tpu.matmul %14, %13, %cst_11 {dimension_numbers = #tpu.dot_dimension_numbers<[1], [0], [0], [1], [0, 0, 1, 1], [], []>} : vector<4x32xbf16>, vector<32x256xbf16>, vector<4x256xf32> -> vector<4x256xf32>
    %c0_12 = arith.constant 0 : index
    %c0_13 = arith.constant 0 : index
    %16 = vector.load %arg7[%c0_12, %c0_13] : memref<4x1xf32, #tpu.memory_space<vmem>>, vector<4x1xf32>
    %17 = vector.broadcast %16 : vector<4x1xf32> to vector<4x256xf32>
    %18 = arith.mulf %15, %17 : vector<4x256xf32>
    %c0_14 = arith.constant 0 : index
    %c0_15 = arith.constant 0 : index
    %19 = vector.load %arg8[%c0_14, %c0_15] : memref<4x1xf32, #tpu.memory_space<vmem>>, vector<4x1xf32>
    %20 = vector.broadcast %19 : vector<4x1xf32> to vector<4x256xf32>
    %21 = arith.addf %18, %20 : vector<4x256xf32>
    %22 = arith.addf %21, %1 : vector<4x256xf32>
    %c0_16 = arith.constant 0 : index
    %c0_17 = arith.constant 0 : index
    %c0_18 = arith.constant 0 : index
    %23 = vector.load %arg9[%c0_16, %c0_17, %c0_18] : memref<1x4x256xf32, #tpu.memory_space<vmem>>, vector<1x4x256xf32>
    %24 = vector.shape_cast %23 : vector<1x4x256xf32> to vector<4x256xf32>
    %25 = vector.shape_cast %22 : vector<4x256xf32> to vector<1x4x256xf32>
    tpu.vector_store %arg9[%c0_16, %c0_17, %c0_18], %25 {strides = array<i32>} : memref<1x4x256xf32, #tpu.memory_space<vmem>>, vector<1x4x256xf32>,
    return
  }
  func.func @transform_0(%arg0: i32, %arg1: i32) -> (i32, i32, i32) {
    %c0_i32 = arith.constant 0 : i32
    %c0_i32_0 = arith.constant 0 : i32
    return %arg0, %c0_i32, %arg1 : i32, i32, i32
  }
  func.func @transform_1(%arg0: i32, %arg1: i32) -> (i32, i32) {
    %c0_i32 = arith.constant 0 : i32
    %c0_i32_0 = arith.constant 0 : i32
    %c0_i32_1 = arith.constant 0 : i32
    return %c0_i32, %c0_i32_0 : i32, i32
  }
  func.func @transform_2(%arg0: i32, %arg1: i32) -> (i32, i32) {
    %c0_i32 = arith.constant 0 : i32
    %c0_i32_0 = arith.constant 0 : i32
    %c0_i32_1 = arith.constant 0 : i32
    return %c0_i32, %c0_i32_0 : i32, i32
  }
  func.func @transform_3(%arg0: i32, %arg1: i32) -> (i32, i32) {
    %c0_i32 = arith.constant 0 : i32
    %c0_i32_0 = arith.constant 0 : i32
    %c0_i32_1 = arith.constant 0 : i32
    return %c0_i32, %c0_i32_0 : i32, i32
  }
  func.func @transform_4(%arg0: i32, %arg1: i32) -> (i32, i32) {
    %c0_i32 = arith.constant 0 : i32
    %c0_i32_0 = arith.constant 0 : i32
    %c0_i32_1 = arith.constant 0 : i32
    return %c0_i32, %c0_i32_0 : i32, i32
  }
  func.func @transform_5(%arg0: i32, %arg1: i32) -> (i32, i32) {
    %c0_i32 = arith.constant 0 : i32
    %c0_i32_0 = arith.constant 0 : i32
    %c0_i32_1 = arith.constant 0 : i32
    return %c0_i32, %c0_i32_0 : i32, i32
  }
  func.func @transform_6(%arg0: i32, %arg1: i32) -> (i32, i32) {
    %c0_i32 = arith.constant 0 : i32
    %c0_i32_0 = arith.constant 0 : i32
    %c0_i32_1 = arith.constant 0 : i32
    return %c0_i32, %c0_i32_0 : i32, i32
  }
  func.func @transform_7(%arg0: i32, %arg1: i32) -> (i32, i32, i32) {
    %c0_i32 = arith.constant 0 : i32
    %c0_i32_0 = arith.constant 0 : i32
    return %arg0, %c0_i32, %arg1 : i32, i32, i32
  }
}

</mosaic_0001>

<bundles_post_ra>
// kernel: tpu_custom_call.1
= control target key start
LH: loop header
LB: loop body
LE: loop exit
PB: predicated region body
PF: predicated region fallthrough
CT: control target
= control target key end

     0   :  { %12 = vsyncpa [#allocation3], 0  ;;  %s963_s0 = inlined_call_operand.vmem [shape: f32[2,4,256], index: 0, kind: input, shape index: {}]   ;;  %s964_s1 = inlined_call_operand.vmem [shape: bf16[32,4], index: 1, kind: input, shape index: {}]   ;;  %s965_s2 = inlined_call_operand.vmem [shape: f32[32,1], index: 2, kind: input, shape index: {}]   ;;  %s966_s3 = inlined_call_operand.vmem [shape: f32[32,1], index: 3, kind: input, shape index: {}]   ;;  %s967_s4 = inlined_call_operand.vmem [shape: bf16[4,32], index: 4, kind: input, shape index: {}]   ;;  %s968_s5 = inlined_call_operand.vmem [shape: f32[4,1], index: 5, kind: input, shape index: {}]   ;;  %s969_s6 = inlined_call_operand.vmem [shape: f32[4,1], index: 6, kind: input, shape index: {}]   ;;  %s970_s7 = inlined_call_operand.hbm [shape: f32[2,4,256], index: 7, kind: output, shape index: {}]  }
   0x1   :  { %14 = vsyncpa [#allocation3 + $0x1], 0  ;;  %s827_s24 = smov 0   ;;  %s829_s25 = smov 0  }
   0x2   :  { %s831_s26 = smov 0   ;;  %s833_s27 = smov 0  }
   0x3   :  { %s835_s28 = smov 0   ;;  %s837_s29 = smov 0  }
   0x4 LB: > { %s616_s30 = sadd.s32 4294967295, %s784_s29   ;;  %s617_s8 = sadd.s32 4294967294, %s784_s29   ;;  %s784_s29 = sphi %s837_s29, %s20_s29   ;;  %s780_s28 = sphi %s835_s28, %s977_s28   ;;  %s776_s27 = sphi %s833_s27, %s976_s27   ;;  %s772_s26 = sphi %s831_s26, %s975_s26   ;;  %s768_s25 = sphi %s829_s25, %s974_s25   ;;  %s764_s24 = sphi %s827_s24, %s973_s24  }
   0x5   : > { %s32_s9 = sadd.s32 1, %s780_s28  ;;  %s195_s10 = sadd.s32 1, %s772_s26 }
   0x6   : > { %p34_p0 = scmp.ge.s32.totalorder %s32_s9, 2  ;;  %p205_p1 = scmp.ne.s32.totalorder %s772_s26, %s768_s25 }
   0x7   : > { %p206_p2 = scmp.eq.s32.totalorder %s616_s30, 1  ;;  %p211_p3 = scmp.ne.s32.totalorder %s768_s25, %s764_s24 }
   0x8   : > { %s979_s9 = smov (%p34_p0, %s32_s9), 0  ;;  %p212_p5 = scmp.eq.s32.totalorder %s617_s8, 1 }
   0x9   : > { %p867_p4 = por %p206_p2, %p205_p1  ;;  %s190_s12 = ssub.s32 %s780_s28, %s979_s9 }
   0xa   : > { %p620_p6 = scmp.ge.s32.totalorder %s784_s29, 1  ;;  %p193_p7 = scmp.eq.s32.totalorder %s190_s12, 0 }
   0xb   : > { %p874_p8 = por %p212_p5, %p211_p3  ;;  %p261_p9 = scmp.lt.s32.totalorder %s784_s29, 3 }
   0xc   : > { %s880_s14 = scalar_select %p193_p7, %s772_s26, %s195_s10  }
   0xd   : > { %p262_p10 = pnand %p620_p6, %p261_p9 }
   0xe   : > { %p298_p11 = scmp.lt.s32.totalorder (!%p262_p10), %s776_s27, 1  ;;  %s646_s22 = sshll.u32 (!%p262_p10), %s776_s27, 3 }
   0xf   : > { %265 = sbr.rel (%p262_p10) target bundleno = 348 (0x15c), region = 48  ;;  %s535_s8 = scalar_lea.hbm (!%p262_p10), %s970_s7, %s646_s22 }
  0x10   : > { %s539_s15 = sshll.u32 (!%p262_p10), %s535_s8, 4  ;;  %s540_s15 = int_to_ptr.hbm [resolvable:$true] %s539_s15 }
  0x11   : > { %s720_s16 = sshra.s32 (!%p262_p10), %s540_s15, 4  ;;  %s721_s16 = int_to_ptr.hbm [resolvable:$true] %s720_s16 }
  0x12   : > { %s722_s17 = scalar_lea.hbm (!%p262_p10), %s721_s16, 8  ;;  %p727_p1 = scmp.lt.s32.totalorder (!%p262_p10), %s721_s16, %s970_s7 }
  0x13   : > { %p723_p12 = scmp.ne.s32.totalorder (!%p262_p10), %s721_s16, %s722_s17 }
  0x14   : > { %v386_v0 = vld [vmem:[%s965_s2 + $0x10] sm:$0xff]  ;;  %v786_v1 = vmov 0   ;;  %s299_s19 = scalar_select %p298_p11, %s776_s27, 1  ;;  %v384_v3 = vld [vmem:[%s965_s2] sm:$0xff]  ;;  %v387_v5 = vld [vmem:[%s965_s2 + $0x18] sm:$0xff]  ;;  %vm339_vm0 = vcmask 1041408  }
  0x15   : > { %703 = vset.pattern.permute.xlu0 %v786_v1  ;;  %704 = vset.pattern.permute.xlu1 %v786_v1  ;;  %v418_v2 = vld [vmem:[%s966_s3 + $0x10] sm:$0xff]  ;;  %v419_v6 = vld [vmem:[%s966_s3 + $0x18] sm:$0xff]  ;;  %v385_v7 = vld [vmem:[%s965_s2 + $0x8] sm:$0xff]  ;;  %vm332_vm1 = vcmask 31744   ;;  %vm461_vm2 = vcmask 261120   ;;  %vm517_vm3 = vcmask 1043456   ;;  %p724_p13 = pnand %p723_p12, %p867_p4 }
  0x16   : > { %400 = vperm.xlu0 %703, %v386_v0   ;;  %432 = vperm.xlu1 %704, %v418_v2   ;;  %s643_s20 = sshll.u32 %s299_s19, 3  ;;  %v416_v12 = vld [vmem:[%s966_s3] sm:$0xff]  ;;  %v417_v13 = vld [vmem:[%s966_s3 + $0x8] sm:$0xff] }
  0x17   : > { %705 = vset.pattern.permute.xlu2 %v786_v1  ;;  %s305_s23 = scalar_lea.vmem %s963_s0, %s643_s20  ;;  %v644_v16 = vld [vmem:[%s964_s1] sm:$0xff]  ;;  %v645_v19 = vld [vmem:[%s964_s1 + $0x8] sm:$0xff]  ;;  %s294_s20 = sand.u32 1, %s768_s25  }
  0x18   : > { %v309_v4 = vld [vmem:[%s305_s23] sm:$0xff]  ;;  %390 = vperm.xlu2 %705, %v384_v3   ;;  %s621_s21 = sshll.u32 %s294_s20, 3  ;;  %s522_s27 = scalar_lea.sflag [#allocation3], %s294_s20 }
  0x19   : > { %311 = vst [vmem:[#allocation1] ss:$2 sm:$0xff] %v309_v4  ;;  %v491_v17 = vld [vmem:[%s968_s5] sm:$0xf]  ;;  %s296_s10 = scalar_lea.vmem [#allocation2], %s621_s21  ;;  %p725_p0 = pneg %p724_p13 }
  0x1a   : > { %v499_v18 = vld [vmem:[%s969_s6] sm:$0xf]  ;;  %s537_s12 = sshll.u32 %s296_s10, 4  ;;  %s726_s21 = scalar_lea.hbm %s970_s7, 16  ;;  %s538_s12 = int_to_ptr.vmem [resolvable:$true] %s537_s12 }
  0x1b   : > { %v460_v0 = vld [vmem:[%s967_s4] sm:$0x3]  ;;  %p728_p2 = scmp.lt.s32.totalorder %s726_s21, %s722_s17 }
  0x1d   : > { %p729_p3 = por %p728_p2, %p727_p1 }
  0x1e   : > { %405 = vperm.xlu0 %703, %v387_v5   ;;  %437 = vperm.xlu1 %704, %v419_v6  }
  0x1f   : > { %p730_p5 = pnand %p729_p3, %p725_p0 }
  0x20   : > { %v312_v8 = vld.sshfl [vmem:[#allocation1] sm:$0xff pattern:$0x75316420]  ;;  %v313_v9 = vld.sshfl [vmem:[#allocation1 + $0x8] sm:$0xff pattern:$0x75316420]  ;;  %395 = vperm.xlu2 %705, %v385_v7  }
  0x21   : > { %v316_v10 = vpack.c.bf16 %v312_v8, %v312_v8  ;;  %v317_v11 = vpack.c.bf16 %v313_v9, %v313_v9  ;;  %507 = vst [vmem:[#allocation1] ss:$2 sm:$0xff] %v309_v4 }
  0x23   : > { %v341_v14 = vsel %vm339_vm0, %v316_v10, 0  ;;  %v344_v15 = vsel %vm339_vm0, %v317_v11, 0 }
  0x24   : > { %353 = vmatpush.bf16.msra.mxu0 %v341_v14  ;;  %372 = vmatpush.bf16.msra.mxu1 %v344_v15 }
  0x26   : > { %422 = vperm.xlu0 %703, %v416_v12   ;;  %427 = vperm.xlu1 %704, %v417_v13  }
  0x27   : > { %632 = vmatmul.msk.bf16.vlgmr.msra.gmra.mxu0 %vm332_vm1, %v644_v16  ;;  %634 = vmatmul.msk.bf16.vlgmr.msra.gmra.mxu1 %vm332_vm1, %v644_v16 }
  0x28   : > { %494 = vperm.xlu2 %705, %v491_v17   ;;  %v509_v7 = vld.sshfl [vmem:[#allocation1 + $0x8] sm:$0xff pattern:$0x75316420]  ;;  %v508_v10 = vld.sshfl [vmem:[#allocation1] sm:$0xff pattern:$0x75316420] }
  0x2e   : > { %502 = vperm.xlu0 %703, %v499_v18  }
  0x37   : > { %633 = vmatmul.msk.bf16.gmra.mxu0 %vm332_vm1, %v645_v19  ;;  %635 = vmatmul.msk.bf16.gmra.mxu1 %vm332_vm1, %v645_v19 }
  0x72   : > { %v391_v26 = vpop.permute.xlu2 %390 }
  0x7a   : > { %v396_v31 = vpop.permute.xlu2 %395 }
  0x82   : > { %v495_v1 = vpop.permute.xlu2 %494 }
  0x88   : > { %v433_v22 = vpop.permute.xlu1 %432  ;;  %v401_v23 = vpop.permute.xlu0 %400 }
  0x90   : > { %v438_v27 = vpop.permute.xlu1 %437  ;;  %v406_v28 = vpop.permute.xlu0 %405 }
  0x98   : > { %v428_v36 = vpop.permute.xlu1 %427  ;;  %v423_v41 = vpop.permute.xlu0 %422 }
  0xa0   : > { %v503_v6 = vpop.permute.xlu0 %502 }
  0xa4   : > { %v355_v20 = vpop.f32.mrf.mxu0  ;;  %v374_v21 = vpop.f32.mrf.mxu1 }
  0xa5   : > { %v408_v37 = vmul.f32 %v391_v26, %v355_v20  ;;  %v409_v38 = vmul.f32 %v391_v26, %v374_v21 }
  0xa7   : > { %v440_v50 = vadd.f32 %v423_v41, %v408_v37  ;;  %v441_v51 = vadd.f32 %v423_v41, %v409_v38 }
  0xa9   : > { %v448_v60 = vmax.f32 %v440_v50, 0.0  ;;  %v449_v61 = vmax.f32 %v441_v51, 0.0 }
  0xac   : > { %v357_v24 = vpop.f32.mrf.mxu0  ;;  %v376_v25 = vpop.f32.mrf.mxu1 }
  0xad   : > { %v410_v34 = vmul.f32 %v396_v31, %v357_v24  ;;  %v411_v35 = vmul.f32 %v396_v31, %v376_v25 }
  0xaf   : > { %v442_v46 = vadd.f32 %v428_v36, %v410_v34  ;;  %v443_v47 = vadd.f32 %v428_v36, %v411_v35 }
  0xb1   : > { %v450_v56 = vmax.f32 %v442_v46, 0.0  ;;  %v451_v57 = vmax.f32 %v443_v47, 0.0 }
  0xb3   : > { %v456_v62 = vpack.c.bf16 %v450_v56, %v448_v60  ;;  %v457_v63 = vpack.c.bf16 %v451_v57, %v449_v61 }
  0xb4   : > { %v360_v29 = vpop.f32.mrf.mxu0  ;;  %v379_v30 = vpop.f32.mrf.mxu1 }
  0xb5   : > { %v412_v32 = vmul.f32 %v401_v23, %v360_v29  ;;  %v413_v33 = vmul.f32 %v401_v23, %v379_v30 }
  0xb7   : > { %v444_v44 = vadd.f32 %v433_v22, %v412_v32  ;;  %v445_v45 = vadd.f32 %v433_v22, %v413_v33 }
  0xb9   : > { %v452_v52 = vmax.f32 %v444_v44, 0.0  ;;  %v453_v54 = vmax.f32 %v445_v45, 0.0 }
  0xbc   : > { %v362_v39 = vpop.f32.mrf.mxu0  ;;  %v381_v40 = vpop.f32.mrf.mxu1 }
  0xbd   : > { %v414_v42 = vmul.f32 %v406_v28, %v362_v39  ;;  %v415_v43 = vmul.f32 %v406_v28, %v381_v40 }
  0xbf   : > { %v446_v48 = vadd.f32 %v438_v27, %v414_v42  ;;  %v447_v49 = vadd.f32 %v438_v27, %v415_v43 }
  0xc1   : > { %v454_v53 = vmax.f32 %v446_v48, 0.0  ;;  %v455_v55 = vmax.f32 %v447_v49, 0.0 }
  0xc3   : > { %v458_v58 = vpack.c.bf16 %v454_v53, %v452_v52  ;;  %v459_v59 = vpack.c.bf16 %v455_v55, %v453_v54 }
  0xc5   : > { %471 = vmatpush.bf16.msra.mxu2 %v458_v58  ;;  %484 = vmatpush.bf16.msra.mxu3 %v459_v59 }
  0xc9   : > { %472 = vmatpush.bf16.msra.mxu2 %v456_v62  ;;  %485 = vmatpush.bf16.msra.mxu3 %v457_v63 }
  0xcc   : > { %636 = vmatmul.msk.bf16.vlgmr.msra.gmra.mxu2 %vm461_vm2, %v460_v0  ;;  %637 = vmatmul.msk.bf16.vlgmr.msra.gmra.mxu3 %vm461_vm2, %v460_v0 }
 0x14f   : > { %v474_v2 = vpop.f32.mrf.mxu2  ;;  %v487_v3 = vpop.f32.mrf.mxu3 }
 0x150   : > { %v497_v4 = vmul.f32 %v495_v1, %v474_v2  ;;  %v498_v5 = vmul.f32 %v495_v1, %v487_v3 }
 0x152   : > { %v505_v8 = vadd.f32 %v503_v6, %v497_v4  ;;  %v506_v9 = vadd.f32 %v503_v6, %v498_v5 }
 0x154   : > { %v513_v11 = vadd.f32 %v509_v7, %v506_v9  ;;  %v512_v12 = vadd.f32 %v508_v10, %v505_v8 }
 0x156   : > { %v516_v13 = vrot.slane %v513_v11, 4 }
 0x157   : > { %v476_v14 = vpop.f32.mrf.mxu2  ;;  %v489_v15 = vpop.f32.mrf.mxu3 }
 0x158   : > { %v518_v16 = vsel %vm517_vm3, %v512_v12, %v516_v13 }
 0x159   : > { %520 = vst [vmem:[%s296_s10] sm:$0xff] %v518_v16 }
 0x15a   : > { %733 = shalt.err (!%p730_p5)
}
 0x15b   : > { %647 = dma.vmem_to_hbm [thread:$0]  (%p867_p4), %s538_s12, 128, %s540_s15, %s522_s27  }
 0x15c PF: > { %p653_p6 = scmp.ge.s32.totalorder %s784_s29, 2  ;;  %s551_s20 = sand.u32 1, %s764_s24  }
 0x15d   : > { %s552_s30 = scalar_lea.sflag [#allocation3], %s551_s20 }
 0x15e   : > { %p650_p7 = pnand %p653_p6, %p874_p8 }
 0x160   : > { %p651_p9 = pneg %p650_p7 }
 0x162   : > { %759 = dma.done.wait (%p651_p9), %s552_s30, 128  }
 0x163   : > { %761 = vsyncadd (%p651_p9), %s552_s30, 4294967168  ;;  %s20_s29 = sadd.s32 1, %s784_s29   ;;  %s973_s24 = smov %s768_s25 }
 0x164   : > { %p17_p10 = scmp.ge.s32.totalorder %s20_s29, 4   ;;  %s974_s25 = smov %s772_s26 }
 0x165   : > { %s975_s26 = smov %s880_s14  ;;  %s976_s27 = smov %s780_s28 }
 0x166   : > { %s977_s28 = smov %s979_s9  ;;  %19 = sbr.rel (!%p17_p10) target bundleno = 4 (0x4), region = 83 }
 0x16b   :  { %558 = vsyncpa [#allocation3], 1 }
 0x16c   :  { %560 = vsyncpa [#allocation3 + $0x1], 1 }

// kernel: tpu_custom_call.1
= control target key start
LH: loop header
LB: loop body
LE: loop exit
PB: predicated region body
PF: predicated region fallthrough
CT: control target
= control target key end

     0   :  { %12 = vsyncpa [#allocation3], 0  ;;  %s963_s0 = inlined_call_operand.vmem [shape: f32[2,4,256], index: 0, kind: input, shape index: {}]   ;;  %s964_s1 = inlined_call_operand.vmem [shape: bf16[32,4], index: 1, kind: input, shape index: {}]   ;;  %s965_s2 = inlined_call_operand.vmem [shape: f32[32,1], index: 2, kind: input, shape index: {}]   ;;  %s966_s3 = inlined_call_operand.vmem [shape: f32[32,1], index: 3, kind: input, shape index: {}]   ;;  %s967_s4 = inlined_call_operand.vmem [shape: bf16[4,32], index: 4, kind: input, shape index: {}]   ;;  %s968_s5 = inlined_call_operand.vmem [shape: f32[4,1], index: 5, kind: input, shape index: {}]   ;;  %s969_s6 = inlined_call_operand.vmem [shape: f32[4,1], index: 6, kind: input, shape index: {}]   ;;  %s970_s7 = inlined_call_operand.hbm [shape: f32[2,4,256], index: 7, kind: output, shape index: {}]  }
   0x1   :  { %14 = vsyncpa [#allocation3 + $0x1], 0  ;;  %s827_s24 = smov 0   ;;  %s829_s25 = smov 0  }
   0x2   :  { %s831_s26 = smov 0   ;;  %s833_s27 = smov 0  }
   0x3   :  { %s835_s28 = smov 0   ;;  %s837_s29 = smov 0  }
   0x4 LB: > { %s616_s30 = sadd.s32 4294967295, %s784_s29   ;;  %s617_s8 = sadd.s32 4294967294, %s784_s29   ;;  %s784_s29 = sphi %s837_s29, %s20_s29   ;;  %s780_s28 = sphi %s835_s28, %s977_s28   ;;  %s776_s27 = sphi %s833_s27, %s976_s27   ;;  %s772_s26 = sphi %s831_s26, %s975_s26   ;;  %s768_s25 = sphi %s829_s25, %s974_s25   ;;  %s764_s24 = sphi %s827_s24, %s973_s24  }
   0x5   : > { %s32_s9 = sadd.s32 1, %s780_s28  ;;  %s195_s10 = sadd.s32 1, %s772_s26 }
   0x6   : > { %p34_p0 = scmp.ge.s32.totalorder %s32_s9, 2  ;;  %p205_p1 = scmp.ne.s32.totalorder %s772_s26, %s768_s25 }
   0x7   : > { %p206_p2 = scmp.eq.s32.totalorder %s616_s30, 1  ;;  %p211_p3 = scmp.ne.s32.totalorder %s768_s25, %s764_s24 }
   0x8   : > { %s979_s9 = smov (%p34_p0, %s32_s9), 0  ;;  %p212_p5 = scmp.eq.s32.totalorder %s617_s8, 1 }
   0x9   : > { %p867_p4 = por %p206_p2, %p205_p1  ;;  %s190_s12 = ssub.s32 %s780_s28, %s979_s9 }
   0xa   : > { %p620_p6 = scmp.ge.s32.totalorder %s784_s29, 1  ;;  %p193_p7 = scmp.eq.s32.totalorder %s190_s12, 0 }
   0xb   : > { %p874_p8 = por %p212_p5, %p211_p3  ;;  %p261_p9 = scmp.lt.s32.totalorder %s784_s29, 3 }
   0xc   : > { %s880_s14 = scalar_select %p193_p7, %s772_s26, %s195_s10  }
   0xd   : > { %p262_p10 = pnand %p620_p6, %p261_p9 }
   0xe   : > { %p298_p11 = scmp.lt.s32.totalorder (!%p262_p10), %s776_s27, 1  ;;  %s646_s22 = sshll.u32 (!%p262_p10), %s776_s27, 3 }
   0xf   : > { %265 = sbr.rel (%p262_p10) target bundleno = 348 (0x15c), region = 48  ;;  %s535_s8 = scalar_lea.hbm (!%p262_p10), %s970_s7, %s646_s22 }
  0x10   : > { %s539_s15 = sshll.u32 (!%p262_p10), %s535_s8, 4  ;;  %s540_s15 = int_to_ptr.hbm [resolvable:$true] %s539_s15 }
  0x11   : > { %s720_s16 = sshra.s32 (!%p262_p10), %s540_s15, 4  ;;  %s721_s16 = int_to_ptr.hbm [resolvable:$true] %s720_s16 }
  0x12   : > { %s722_s17 = scalar_lea.hbm (!%p262_p10), %s721_s16, 8  ;;  %p727_p1 = scmp.lt.s32.totalorder (!%p262_p10), %s721_s16, %s970_s7 }
  0x13   : > { %p723_p12 = scmp.ne.s32.totalorder (!%p262_p10), %s721_s16, %s722_s17 }
  0x14   : > { %v386_v0 = vld [vmem:[%s965_s2 + $0x10] sm:$0xff]  ;;  %v786_v1 = vmov 0   ;;  %s299_s19 = scalar_select %p298_p11, %s776_s27, 1  ;;  %v384_v3 = vld [vmem:[%s965_s2] sm:$0xff]  ;;  %v387_v5 = vld [vmem:[%s965_s2 + $0x18] sm:$0xff]  ;;  %vm339_vm0 = vcmask 1041408  }
  0x15   : > { %703 = vset.pattern.permute.xlu0 %v786_v1  ;;  %704 = vset.pattern.permute.xlu1 %v786_v1  ;;  %v418_v2 = vld [vmem:[%s966_s3 + $0x10] sm:$0xff]  ;;  %v419_v6 = vld [vmem:[%s966_s3 + $0x18] sm:$0xff]  ;;  %v385_v7 = vld [vmem:[%s965_s2 + $0x8] sm:$0xff]  ;;  %vm332_vm1 = vcmask 31744   ;;  %vm461_vm2 = vcmask 261120   ;;  %vm517_vm3 = vcmask 1043456   ;;  %p724_p13 = pnand %p723_p12, %p867_p4 }
  0x16   : > { %400 = vperm.xlu0 %703, %v386_v0   ;;  %432 = vperm.xlu1 %704, %v418_v2   ;;  %s643_s20 = sshll.u32 %s299_s19, 3  ;;  %v416_v12 = vld [vmem:[%s966_s3] sm:$0xff]  ;;  %v417_v13 = vld [vmem:[%s966_s3 + $0x8] sm:$0xff] }
  0x17   : > { %705 = vset.pattern.permute.xlu2 %v786_v1  ;;  %s305_s23 = scalar_lea.vmem %s963_s0, %s643_s20  ;;  %v644_v16 = vld [vmem:[%s964_s1] sm:$0xff]  ;;  %v645_v19 = vld [vmem:[%s964_s1 + $0x8] sm:$0xff]  ;;  %s294_s20 = sand.u32 1, %s768_s25  }
  0x18   : > { %v309_v4 = vld [vmem:[%s305_s23] sm:$0xff]  ;;  %390 = vperm.xlu2 %705, %v384_v3   ;;  %s621_s21 = sshll.u32 %s294_s20, 3  ;;  %s522_s27 = scalar_lea.sflag [#allocation3], %s294_s20 }
  0x19   : > { %311 = vst [vmem:[#allocation1] ss:$2 sm:$0xff] %v309_v4  ;;  %v491_v17 = vld [vmem:[%s968_s5] sm:$0xf]  ;;  %s296_s10 = scalar_lea.vmem [#allocation2], %s621_s21  ;;  %p725_p0 = pneg %p724_p13 }
  0x1a   : > { %v499_v18 = vld [vmem:[%s969_s6] sm:$0xf]  ;;  %s537_s12 = sshll.u32 %s296_s10, 4  ;;  %s726_s21 = scalar_lea.hbm %s970_s7, 16  ;;  %s538_s12 = int_to_ptr.vmem [resolvable:$true] %s537_s12 }
  0x1b   : > { %v460_v0 = vld [vmem:[%s967_s4] sm:$0x3]  ;;  %p728_p2 = scmp.lt.s32.totalorder %s726_s21, %s722_s17 }
  0x1d   : > { %p729_p3 = por %p728_p2, %p727_p1 }
  0x1e   : > { %405 = vperm.xlu0 %703, %v387_v5   ;;  %437 = vperm.xlu1 %704, %v419_v6  }
  0x1f   : > { %p730_p5 = pnand %p729_p3, %p725_p0 }
  0x20   : > { %v312_v8 = vld.sshfl [vmem:[#allocation1] sm:$0xff pattern:$0x75316420]  ;;  %v313_v9 = vld.sshfl [vmem:[#allocation1 + $0x8] sm:$0xff pattern:$0x75316420]  ;;  %395 = vperm.xlu2 %705, %v385_v7  }
  0x21   : > { %v316_v10 = vpack.c.bf16 %v312_v8, %v312_v8  ;;  %v317_v11 = vpack.c.bf16 %v313_v9, %v313_v9  ;;  %507 = vst [vmem:[#allocation1] ss:$2 sm:$0xff] %v309_v4 }
  0x23   : > { %v341_v14 = vsel %vm339_vm0, %v316_v10, 0  ;;  %v344_v15 = vsel %vm339_vm0, %v317_v11, 0 }
  0x24   : > { %353 = vmatpush.bf16.msra.mxu0 %v341_v14  ;;  %372 = vmatpush.bf16.msra.mxu1 %v344_v15 }
  0x26   : > { %422 = vperm.xlu0 %703, %v416_v12   ;;  %427 = vperm.xlu1 %704, %v417_v13  }
  0x27   : > { %632 = vmatmul.msk.bf16.vlgmr.msra.gmra.mxu0 %vm332_vm1, %v644_v16  ;;  %634 = vmatmul.msk.bf16.vlgmr.msra.gmra.mxu1 %vm332_vm1, %v644_v16 }
  0x28   : > { %494 = vperm.xlu2 %705, %v491_v17   ;;  %v509_v7 = vld.sshfl [vmem:[#allocation1 + $0x8] sm:$0xff pattern:$0x75316420]  ;;  %v508_v10 = vld.sshfl [vmem:[#allocation1] sm:$0xff pattern:$0x75316420] }
  0x2e   : > { %502 = vperm.xlu0 %703, %v499_v18  }
  0x37   : > { %633 = vmatmul.msk.bf16.gmra.mxu0 %vm332_vm1, %v645_v19  ;;  %635 = vmatmul.msk.bf16.gmra.mxu1 %vm332_vm1, %v645_v19 }
  0x72   : > { %v391_v26 = vpop.permute.xlu2 %390 }
  0x7a   : > { %v396_v31 = vpop.permute.xlu2 %395 }
  0x82   : > { %v495_v1 = vpop.permute.xlu2 %494 }
  0x88   : > { %v433_v22 = vpop.permute.xlu1 %432  ;;  %v401_v23 = vpop.permute.xlu0 %400 }
  0x90   : > { %v438_v27 = vpop.permute.xlu1 %437  ;;  %v406_v28 = vpop.permute.xlu0 %405 }
  0x98   : > { %v428_v36 = vpop.permute.xlu1 %427  ;;  %v423_v41 = vpop.permute.xlu0 %422 }
  0xa0   : > { %v503_v6 = vpop.permute.xlu0 %502 }
  0xa4   : > { %v355_v20 = vpop.f32.mrf.mxu0  ;;  %v374_v21 = vpop.f32.mrf.mxu1 }
  0xa5   : > { %v408_v37 = vmul.f32 %v391_v26, %v355_v20  ;;  %v409_v38 = vmul.f32 %v391_v26, %v374_v21 }
  0xa7   : > { %v440_v50 = vadd.f32 %v423_v41, %v408_v37  ;;  %v441_v51 = vadd.f32 %v423_v41, %v409_v38 }
  0xa9   : > { %v448_v60 = vmax.f32 %v440_v50, 0.0  ;;  %v449_v61 = vmax.f32 %v441_v51, 0.0 }
  0xac   : > { %v357_v24 = vpop.f32.mrf.mxu0  ;;  %v376_v25 = vpop.f32.mrf.mxu1 }
  0xad   : > { %v410_v34 = vmul.f32 %v396_v31, %v357_v24  ;;  %v411_v35 = vmul.f32 %v396_v31, %v376_v25 }
  0xaf   : > { %v442_v46 = vadd.f32 %v428_v36, %v410_v34  ;;  %v443_v47 = vadd.f32 %v428_v36, %v411_v35 }
  0xb1   : > { %v450_v56 = vmax.f32 %v442_v46, 0.0  ;;  %v451_v57 = vmax.f32 %v443_v47, 0.0 }
  0xb3   : > { %v456_v62 = vpack.c.bf16 %v450_v56, %v448_v60  ;;  %v457_v63 = vpack.c.bf16 %v451_v57, %v449_v61 }
  0xb4   : > { %v360_v29 = vpop.f32.mrf.mxu0  ;;  %v379_v30 = vpop.f32.mrf.mxu1 }
  0xb5   : > { %v412_v32 = vmul.f32 %v401_v23, %v360_v29  ;;  %v413_v33 = vmul.f32 %v401_v23, %v379_v30 }
  0xb7   : > { %v444_v44 = vadd.f32 %v433_v22, %v412_v32  ;;  %v445_v45 = vadd.f32 %v433_v22, %v413_v33 }
  0xb9   : > { %v452_v52 = vmax.f32 %v444_v44, 0.0  ;;  %v453_v54 = vmax.f32 %v445_v45, 0.0 }
  0xbc   : > { %v362_v39 = vpop.f32.mrf.mxu0  ;;  %v381_v40 = vpop.f32.mrf.mxu1 }
  0xbd   : > { %v414_v42 = vmul.f32 %v406_v28, %v362_v39  ;;  %v415_v43 = vmul.f32 %v406_v28, %v381_v40 }
  0xbf   : > { %v446_v48 = vadd.f32 %v438_v27, %v414_v42  ;;  %v447_v49 = vadd.f32 %v438_v27, %v415_v43 }
  0xc1   : > { %v454_v53 = vmax.f32 %v446_v48, 0.0  ;;  %v455_v55 = vmax.f32 %v447_v49, 0.0 }
  0xc3   : > { %v458_v58 = vpack.c.bf16 %v454_v53, %v452_v52  ;;  %v459_v59 = vpack.c.bf16 %v455_v55, %v453_v54 }
  0xc5   : > { %471 = vmatpush.bf16.msra.mxu2 %v458_v58  ;;  %484 = vmatpush.bf16.msra.mxu3 %v459_v59 }
  0xc9   : > { %472 = vmatpush.bf16.msra.mxu2 %v456_v62  ;;  %485 = vmatpush.bf16.msra.mxu3 %v457_v63 }
  0xcc   : > { %636 = vmatmul.msk.bf16.vlgmr.msra.gmra.mxu2 %vm461_vm2, %v460_v0  ;;  %637 = vmatmul.msk.bf16.vlgmr.msra.gmra.mxu3 %vm461_vm2, %v460_v0 }
 0x14f   : > { %v474_v2 = vpop.f32.mrf.mxu2  ;;  %v487_v3 = vpop.f32.mrf.mxu3 }
 0x150   : > { %v497_v4 = vmul.f32 %v495_v1, %v474_v2  ;;  %v498_v5 = vmul.f32 %v495_v1, %v487_v3 }
 0x152   : > { %v505_v8 = vadd.f32 %v503_v6, %v497_v4  ;;  %v506_v9 = vadd.f32 %v503_v6, %v498_v5 }
 0x154   : > { %v513_v11 = vadd.f32 %v509_v7, %v506_v9  ;;  %v512_v12 = vadd.f32 %v508_v10, %v505_v8 }
 0x156   : > { %v516_v13 = vrot.slane %v513_v11, 4 }
 0x157   : > { %v476_v14 = vpop.f32.mrf.mxu2  ;;  %v489_v15 = vpop.f32.mrf.mxu3 }
 0x158   : > { %v518_v16 = vsel %vm517_vm3, %v512_v12, %v516_v13 }
 0x159   : > { %520 = vst [vmem:[%s296_s10] sm:$0xff] %v518_v16 }
 0x15a   : > { %733 = shalt.err (!%p730_p5)
}
 0x15b   : > { %647 = dma.vmem_to_hbm [thread:$0]  (%p867_p4), %s538_s12, 128, %s540_s15, %s522_s27  }
 0x15c PF: > { %p653_p6 = scmp.ge.s32.totalorder %s784_s29, 2  ;;  %s551_s20 = sand.u32 1, %s764_s24  }
 0x15d   : > { %s552_s30 = scalar_lea.sflag [#allocation3], %s551_s20 }
 0x15e   : > { %p650_p7 = pnand %p653_p6, %p874_p8 }
 0x160   : > { %p651_p9 = pneg %p650_p7 }
 0x162   : > { %759 = dma.done.wait (%p651_p9), %s552_s30, 128  }
 0x163   : > { %761 = vsyncadd (%p651_p9), %s552_s30, 4294967168  ;;  %s20_s29 = sadd.s32 1, %s784_s29   ;;  %s973_s24 = smov %s768_s25 }
 0x164   : > { %p17_p10 = scmp.ge.s32.totalorder %s20_s29, 4   ;;  %s974_s25 = smov %s772_s26 }
 0x165   : > { %s975_s26 = smov %s880_s14  ;;  %s976_s27 = smov %s780_s28 }
 0x166   : > { %s977_s28 = smov %s979_s9  ;;  %19 = sbr.rel (!%p17_p10) target bundleno = 4 (0x4), region = 83 }
 0x16b   :  { %558 = vsyncpa [#allocation3], 1 }
 0x16c   :  { %560 = vsyncpa [#allocation3 + $0x1], 1 }

</bundles_post_ra>
